<compile_context>
chip_gen: v5e
topology: v5e:2x2
jax: 0.10.0
libtpu: 0.0.40
codegen_flags: <defaults>
</compile_context>

<pallas_src>
import functools

import jax
import jax.numpy as jnp
from jax.experimental import pallas as pl
from jax.experimental.pallas import tpu as pltpu


def _mha_kernel(x_ref,
                w0_ref, b0_ref,
                wq_ref, bq_ref,
                wk_ref, bk_ref,
                wv_ref, bv_ref,
                w1_ref, b1_ref,
                o_ref,
                *, depth: int, head: int, hidden: int):
    """One grid cell = one batch row, all heads at once.

    x_ref : (1, T, input_size)
    w0_ref: (head, input_size, hidden);  wq/wk/wv/w1: (head, hidden, hidden)
    b*_ref: (head, 1, hidden)
    o_ref : (1, T, head*hidden)
    """
    T = x_ref.shape[1]
    f32, bf16 = jnp.float32, jnp.bfloat16

    # Broadcast the shared input across heads once: [head, T, input_size].
    x = jnp.broadcast_to(x_ref[0], (head, T, x_ref.shape[2]))

    # Hoisted out of the depth loop: bf16 weight casts + bias broadcasts.
    w0 = w0_ref[...].astype(bf16)
    wq = wq_ref[...].astype(bf16)
    wk = wk_ref[...].astype(bf16)
    wv = wv_ref[...].astype(bf16)
    w1 = w1_ref[...].astype(bf16)
    b0 = jnp.broadcast_to(b0_ref[...], (head, T, hidden))
    bq = jnp.broadcast_to(bq_ref[...], (head, T, hidden))
    bk = jnp.broadcast_to(bk_ref[...], (head, T, hidden))
    bv = jnp.broadcast_to(bv_ref[...], (head, T, hidden))
    b1 = jnp.broadcast_to(b1_ref[...], (head, T, hidden))

    def hmm(a, w):
        # [head, T, d] @ [head, d, e] -> [head, T, e]; bf16 operands, f32 acc.
        return jax.lax.dot_general(
            a.astype(bf16), w,
            dimension_numbers=(((2,), (1,)), ((0,), (0,))),
            preferred_element_type=f32)

    # fc0: Linear + ReLU  (Dropout = identity in eval mode)
    hs = jnp.maximum(hmm(x, w0) + b0, 0.0)                     # [head, T, hidden]

    def attn_step(hs):
        q = jnp.tanh(hmm(hs, wq) + bq)
        k = jnp.tanh(hmm(hs, wk) + bk)
        v = jnp.tanh(hmm(hs, wv) + bv)
        # a = q @ k^T per head: contract feature dims directly (no transpose).
        a = jax.lax.dot_general(
            q.astype(bf16), k.astype(bf16),
            dimension_numbers=(((2,), (2,)), ((0,), (0,))),
            preferred_element_type=f32)                        # [head, T, T]
        a = a - jnp.max(a, axis=-1, keepdims=True)
        e = jnp.exp(a)
        p = e * pl.reciprocal(jnp.sum(e, axis=-1, keepdims=True), approx=True)
        c = jax.lax.dot_general(
            p.astype(bf16), v.astype(bf16),
            dimension_numbers=(((2,), (1,)), ((0,), (0,))),
            preferred_element_type=f32)                        # [head, T, hidden]
        # fc1: Linear + ReLU
        return jnp.maximum(hmm(c, w1) + b1, 0.0)

    if depth <= 4:
        # Short fixed trip count: unroll at trace time (LLO visibility).
        for _ in range(depth):
            hs = attn_step(hs)
    else:
        # Deep stacks: bound live ranges / code size.
        hs = jax.lax.fori_loop(0, depth, lambda _, h: attn_step(h), hs)

    # Concatenate heads on the last axis -> one lane-dense write of the full
    # (T, head*hidden) output block (matches torch.cat(ys, dim=2)).
    out = jnp.concatenate([hs[h] for h in range(head)], axis=-1)
    o_ref[0] = out.astype(o_ref.dtype)


def multi_head_attention(x, params, *, depth: int):
    """x: [B, T, input_size]; params: stacked per-head weights.

    Returns [B, T, head * hidden_size].
    """
    B, T, input_size = x.shape
    head, _, hidden = params["w0"].shape          # w0: [head, input_size, hidden]
    hd = head * hidden

    def whole(shape):
        # Full-array block, same for every grid cell (stays resident in VMEM).
        return pl.BlockSpec(shape, lambda b, _s=shape: (0,) * len(_s))

    grid_spec = pltpu.PrefetchScalarGridSpec(
        num_scalar_prefetch=0,
        grid=(B,),
        in_specs=[
            pl.BlockSpec((1, T, input_size), lambda b: (b, 0, 0)),          # x
            whole((head, input_size, hidden)), whole((head, 1, hidden)),    # fc0
            whole((head, hidden, hidden)), whole((head, 1, hidden)),        # q
            whole((head, hidden, hidden)), whole((head, 1, hidden)),        # k
            whole((head, hidden, hidden)), whole((head, 1, hidden)),        # v
            whole((head, hidden, hidden)), whole((head, 1, hidden)),        # fc1
        ],
        out_specs=pl.BlockSpec((1, T, hd), lambda b: (b, 0, 0)),
    )

    kernel = functools.partial(_mha_kernel, depth=depth, head=head,
                               hidden=hidden)

    return pl.pallas_call(
        kernel,
        out_shape=jax.ShapeDtypeStruct((B, T, hd), jnp.float32),
        grid_spec=grid_spec,
        compiler_params=pltpu.CompilerParams(
            dimension_semantics=("parallel",),
            vmem_limit_bytes=32 * 1024 * 1024),
    )(x,
      params["w0"], params["b0"],
      params["wq"], params["bq"],
      params["wk"], params["bk"],
      params["wv"], params["bv"],
      params["w1"], params["b1"])


def _init_params(key, head, input_size, hidden):
    """Deterministic synthetic init. Weights stored as [head, in, out]."""
    def lin(k, d_in, d_out):
        kw, kb = jax.random.split(k)
        bound = 1.0 / jnp.sqrt(d_in)
        w = jax.random.uniform(kw, (head, d_in, d_out), jnp.float32,
                               -bound, bound)
        b = jax.random.uniform(kb, (head, 1, d_out), jnp.float32,
                               -bound, bound)
        return w, b

    keys = jax.random.split(key, 5)
    w0, b0 = lin(keys[0], input_size, hidden)
    wq, bq = lin(keys[1], hidden, hidden)
    wk, bk = lin(keys[2], hidden, hidden)
    wv, bv = lin(keys[3], hidden, hidden)
    w1, b1 = lin(keys[4], hidden, hidden)
    return dict(w0=w0, b0=b0, wq=wq, bq=bq, wk=wk, bk=bk,
                wv=wv, bv=bv, w1=w1, b1=b1)


def _reference(x, params, depth):
    """Pure-JAX f32 reference of the PyTorch forward (eval mode)."""
    outs = []
    head = params["w0"].shape[0]
    for h in range(head):
        hs = jax.nn.relu(x @ params["w0"][h] + params["b0"][h])
        for _ in range(depth):
            q = jnp.tanh(hs @ params["wq"][h] + params["bq"][h])
            k = jnp.tanh(hs @ params["wk"][h] + params["bk"][h])
            v = jnp.tanh(hs @ params["wv"][h] + params["bv"][h])
            a = jnp.einsum("btd,bsd->bts", q, k)
            a = jax.nn.softmax(a, axis=2)
            hs = jax.nn.relu(jnp.einsum("bts,bsd->btd", a, v)
                             @ params["w1"][h] + params["b1"][h])
        outs.append(hs)
    return jnp.concatenate(outs, axis=2)


if __name__ == "__main__":
    B, T, input_size, hidden, head, depth = 2, 8, 4, 32, 2, 2

    key = jax.random.PRNGKey(0)
    kx, kp = jax.random.split(key)
    x = jax.random.normal(kx, (B, T, input_size), jnp.float32)
    params = _init_params(kp, head, input_size, hidden)

    out = jax.block_until_ready(multi_head_attention(x, params, depth=depth))

    ref = _reference(x, params, depth)
    assert out.shape == (B, T, head * hidden), out.shape
    # Tolerance loosened vs the all-f32 version: bf16 MXU operands + approx
    # softmax reciprocal introduce ~1e-2-level deviations over depth=2.
    assert jnp.allclose(out, ref, atol=5e-2, rtol=5e-2), "mismatch vs reference"

    print("KERNEL_OK")
</pallas_src>

<mosaic_0001>
module attributes {stable_mosaic.version = 11 : i64} {
  func.func @_mha_kernel(%arg0: i32, %arg1: memref<1x8x4xf32, #tpu.memory_space<vmem>>, %arg2: memref<2x4x32xf32, #tpu.memory_space<vmem>>, %arg3: memref<2x1x32xf32, #tpu.memory_space<vmem>>, %arg4: memref<2x32x32xf32, #tpu.memory_space<vmem>>, %arg5: memref<2x1x32xf32, #tpu.memory_space<vmem>>, %arg6: memref<2x32x32xf32, #tpu.memory_space<vmem>>, %arg7: memref<2x1x32xf32, #tpu.memory_space<vmem>>, %arg8: memref<2x32x32xf32, #tpu.memory_space<vmem>>, %arg9: memref<2x1x32xf32, #tpu.memory_space<vmem>>, %arg10: memref<2x32x32xf32, #tpu.memory_space<vmem>>, %arg11: memref<2x1x32xf32, #tpu.memory_space<vmem>>, %arg12: memref<1x8x64xf32, #tpu.memory_space<vmem>>) attributes {dimension_semantics = [#tpu.dimension_semantics<parallel>], iteration_bounds = array<i64: 2>, scalar_prefetch = 0 : i64, scratch_operands = 0 : i64, tpu.core_type = #tpu.core_type<tc>, window_params = [{transform_indices = @transform_0, window_bounds = array<i64: 1, 8, 4>}, {pipeline_mode = #tpu.pipeline_mode<synchronous>, transform_indices = @transform_1, window_bounds = array<i64: 2, 4, 32>}, {pipeline_mode = #tpu.pipeline_mode<synchronous>, transform_indices = @transform_2, window_bounds = array<i64: 2, 1, 32>}, {pipeline_mode = #tpu.pipeline_mode<synchronous>, transform_indices = @transform_3, window_bounds = array<i64: 2, 32, 32>}, {pipeline_mode = #tpu.pipeline_mode<synchronous>, transform_indices = @transform_4, window_bounds = array<i64: 2, 1, 32>}, {pipeline_mode = #tpu.pipeline_mode<synchronous>, transform_indices = @transform_5, window_bounds = array<i64: 2, 32, 32>}, {pipeline_mode = #tpu.pipeline_mode<synchronous>, transform_indices = @transform_6, window_bounds = array<i64: 2, 1, 32>}, {pipeline_mode = #tpu.pipeline_mode<synchronous>, transform_indices = @transform_7, window_bounds = array<i64: 2, 32, 32>}, {pipeline_mode = #tpu.pipeline_mode<synchronous>, transform_indices = @transform_8, window_bounds = array<i64: 2, 1, 32>}, {pipeline_mode = #tpu.pipeline_mode<synchronous>, transform_indices = @transform_9, window_bounds = array<i64: 2, 32, 32>}, {pipeline_mode = #tpu.pipeline_mode<synchronous>, transform_indices = @transform_10, window_bounds = array<i64: 2, 1, 32>}, {transform_indices = @transform_11, window_bounds = array<i64: 1, 8, 64>}]} {
    %c0 = arith.constant 0 : index
    %c0_0 = arith.constant 0 : index
    %c0_1 = arith.constant 0 : index
    %0 = vector.load %arg1[%c0, %c0_0, %c0_1] : memref<1x8x4xf32, #tpu.memory_space<vmem>>, vector<1x8x4xf32>
    %1 = vector.shape_cast %0 : vector<1x8x4xf32> to vector<8x4xf32>
    %2 = vector.shape_cast %1 : vector<8x4xf32> to vector<1x8x4xf32>
    %3 = vector.broadcast %2 : vector<1x8x4xf32> to vector<2x8x4xf32>
    %c0_2 = arith.constant 0 : index
    %c0_3 = arith.constant 0 : index
    %c0_4 = arith.constant 0 : index
    %4 = vector.load %arg2[%c0_2, %c0_3, %c0_4] : memref<2x4x32xf32, #tpu.memory_space<vmem>>, vector<2x4x32xf32>
    %5 = arith.truncf %4 : vector<2x4x32xf32> to vector<2x4x32xbf16>
    %c0_5 = arith.constant 0 : index
    %c0_6 = arith.constant 0 : index
    %c0_7 = arith.constant 0 : index
    %6 = vector.load %arg4[%c0_5, %c0_6, %c0_7] : memref<2x32x32xf32, #tpu.memory_space<vmem>>, vector<2x32x32xf32>
    %7 = arith.truncf %6 : vector<2x32x32xf32> to vector<2x32x32xbf16>
    %c0_8 = arith.constant 0 : index
    %c0_9 = arith.constant 0 : index
    %c0_10 = arith.constant 0 : index
    %8 = vector.load %arg6[%c0_8, %c0_9, %c0_10] : memref<2x32x32xf32, #tpu.memory_space<vmem>>, vector<2x32x32xf32>
    %9 = arith.truncf %8 : vector<2x32x32xf32> to vector<2x32x32xbf16>
    %c0_11 = arith.constant 0 : index
    %c0_12 = arith.constant 0 : index
    %c0_13 = arith.constant 0 : index
    %10 = vector.load %arg8[%c0_11, %c0_12, %c0_13] : memref<2x32x32xf32, #tpu.memory_space<vmem>>, vector<2x32x32xf32>
    %11 = arith.truncf %10 : vector<2x32x32xf32> to vector<2x32x32xbf16>
    %c0_14 = arith.constant 0 : index
    %c0_15 = arith.constant 0 : index
    %c0_16 = arith.constant 0 : index
    %12 = vector.load %arg10[%c0_14, %c0_15, %c0_16] : memref<2x32x32xf32, #tpu.memory_space<vmem>>, vector<2x32x32xf32>
    %13 = arith.truncf %12 : vector<2x32x32xf32> to vector<2x32x32xbf16>
    %c0_17 = arith.constant 0 : index
    %c0_18 = arith.constant 0 : index
    %c0_19 = arith.constant 0 : index
    %14 = vector.load %arg3[%c0_17, %c0_18, %c0_19] : memref<2x1x32xf32, #tpu.memory_space<vmem>>, vector<2x1x32xf32>
    %15 = vector.shape_cast %14 : vector<2x1x32xf32> to vector<2x1x32xf32>
    %16 = vector.broadcast %15 : vector<2x1x32xf32> to vector<2x8x32xf32>
    %c0_20 = arith.constant 0 : index
    %c0_21 = arith.constant 0 : index
    %c0_22 = arith.constant 0 : index
    %17 = vector.load %arg5[%c0_20, %c0_21, %c0_22] : memref<2x1x32xf32, #tpu.memory_space<vmem>>, vector<2x1x32xf32>
    %18 = vector.shape_cast %17 : vector<2x1x32xf32> to vector<2x1x32xf32>
    %19 = vector.broadcast %18 : vector<2x1x32xf32> to vector<2x8x32xf32>
    %c0_23 = arith.constant 0 : index
    %c0_24 = arith.constant 0 : index
    %c0_25 = arith.constant 0 : index
    %20 = vector.load %arg7[%c0_23, %c0_24, %c0_25] : memref<2x1x32xf32, #tpu.memory_space<vmem>>, vector<2x1x32xf32>
    %21 = vector.shape_cast %20 : vector<2x1x32xf32> to vector<2x1x32xf32>
    %22 = vector.broadcast %21 : vector<2x1x32xf32> to vector<2x8x32xf32>
    %c0_26 = arith.constant 0 : index
    %c0_27 = arith.constant 0 : index
    %c0_28 = arith.constant 0 : index
    %23 = vector.load %arg9[%c0_26, %c0_27, %c0_28] : memref<2x1x32xf32, #tpu.memory_space<vmem>>, vector<2x1x32xf32>
    %24 = vector.shape_cast %23 : vector<2x1x32xf32> to vector<2x1x32xf32>
    %25 = vector.broadcast %24 : vector<2x1x32xf32> to vector<2x8x32xf32>
    %c0_29 = arith.constant 0 : index
    %c0_30 = arith.constant 0 : index
    %c0_31 = arith.constant 0 : index
    %26 = vector.load %arg11[%c0_29, %c0_30, %c0_31] : memref<2x1x32xf32, #tpu.memory_space<vmem>>, vector<2x1x32xf32>
    %27 = vector.shape_cast %26 : vector<2x1x32xf32> to vector<2x1x32xf32>
    %28 = vector.broadcast %27 : vector<2x1x32xf32> to vector<2x8x32xf32>
    %29 = arith.truncf %3 : vector<2x8x4xf32> to vector<2x8x4xbf16>
    %cst = arith.constant dense<0.000000e+00> : vector<2x8x32xf32>
    %30 = tpu.matmul %29, %5, %cst {dimension_numbers = #tpu.dot_dimension_numbers<[2], [1], [1], [2], [0, 0, 0, 1, 1, 2], [0], [0]>} : vector<2x8x4xbf16>, vector<2x4x32xbf16>, vector<2x8x32xf32> -> vector<2x8x32xf32>
    %31 = arith.addf %30, %16 : vector<2x8x32xf32>
    %cst_32 = arith.constant 0.000000e+00 : f32
    %32 = vector.broadcast %cst_32 : f32 to vector<2x8x32xf32>
    %33 = arith.maximumf %31, %32 : vector<2x8x32xf32>
    %34 = arith.truncf %33 : vector<2x8x32xf32> to vector<2x8x32xbf16>
    %cst_33 = arith.constant dense<0.000000e+00> : vector<2x8x32xf32>
    %35 = tpu.matmul %34, %7, %cst_33 {dimension_numbers = #tpu.dot_dimension_numbers<[2], [1], [1], [2], [0, 0, 0, 1, 1, 2], [0], [0]>} : vector<2x8x32xbf16>, vector<2x32x32xbf16>, vector<2x8x32xf32> -> vector<2x8x32xf32>
    %36 = arith.addf %35, %19 : vector<2x8x32xf32>
    %37 = math.tanh %36 : vector<2x8x32xf32>
    %38 = arith.truncf %33 : vector<2x8x32xf32> to vector<2x8x32xbf16>
    %cst_34 = arith.constant dense<0.000000e+00> : vector<2x8x32xf32>
    %39 = tpu.matmul %38, %9, %cst_34 {dimension_numbers = #tpu.dot_dimension_numbers<[2], [1], [1], [2], [0, 0, 0, 1, 1, 2], [0], [0]>} : vector<2x8x32xbf16>, vector<2x32x32xbf16>, vector<2x8x32xf32> -> vector<2x8x32xf32>
    %40 = arith.addf %39, %22 : vector<2x8x32xf32>
    %41 = math.tanh %40 : vector<2x8x32xf32>
    %42 = arith.truncf %33 : vector<2x8x32xf32> to vector<2x8x32xbf16>
    %cst_35 = arith.constant dense<0.000000e+00> : vector<2x8x32xf32>
    %43 = tpu.matmul %42, %11, %cst_35 {dimension_numbers = #tpu.dot_dimension_numbers<[2], [1], [1], [2], [0, 0, 0, 1, 1, 2], [0], [0]>} : vector<2x8x32xbf16>, vector<2x32x32xbf16>, vector<2x8x32xf32> -> vector<2x8x32xf32>
    %44 = arith.addf %43, %25 : vector<2x8x32xf32>
    %45 = math.tanh %44 : vector<2x8x32xf32>
    %46 = arith.truncf %37 : vector<2x8x32xf32> to vector<2x8x32xbf16>
    %47 = arith.truncf %41 : vector<2x8x32xf32> to vector<2x8x32xbf16>
    %cst_36 = arith.constant dense<0.000000e+00> : vector<2x8x8xf32>
    %48 = tpu.matmul %46, %47, %cst_36 {dimension_numbers = #tpu.dot_dimension_numbers<[2], [2], [1], [1], [0, 0, 0, 1, 1, 1], [0], [0]>} : vector<2x8x32xbf16>, vector<2x8x32xbf16>, vector<2x8x8xf32> -> vector<2x8x8xf32>
    %cst_37 = arith.constant dense<0xFF800000> : vector<2x8xf32>
    %49 = vector.multi_reduction <maximumf>, %48, %cst_37 [2] : vector<2x8x8xf32> to vector<2x8xf32>
    %50 = vector.shape_cast %49 : vector<2x8xf32> to vector<2x8x1xf32>
    %51 = vector.broadcast %50 : vector<2x8x1xf32> to vector<2x8x8xf32>
    %52 = arith.subf %48, %51 : vector<2x8x8xf32>
    %53 = math.exp %52 : vector<2x8x8xf32>
    %cst_38 = arith.constant dense<0.000000e+00> : vector<2x8xf32>
    %54 = vector.multi_reduction <add>, %53, %cst_38 [2] : vector<2x8x8xf32> to vector<2x8xf32>
    %55 = vector.shape_cast %54 : vector<2x8xf32> to vector<2x8x1xf32>
    %56 = tpu.reciprocal %55 {approx = true} : vector<2x8x1xf32> -> vector<2x8x1xf32>
    %57 = vector.broadcast %56 : vector<2x8x1xf32> to vector<2x8x8xf32>
    %58 = arith.mulf %53, %57 : vector<2x8x8xf32>
    %59 = arith.truncf %58 : vector<2x8x8xf32> to vector<2x8x8xbf16>
    %60 = arith.truncf %45 : vector<2x8x32xf32> to vector<2x8x32xbf16>
    %cst_39 = arith.constant dense<0.000000e+00> : vector<2x8x32xf32>
    %61 = tpu.matmul %59, %60, %cst_39 {dimension_numbers = #tpu.dot_dimension_numbers<[2], [1], [1], [2], [0, 0, 0, 1, 1, 2], [0], [0]>} : vector<2x8x8xbf16>, vector<2x8x32xbf16>, vector<2x8x32xf32> -> vector<2x8x32xf32>
    %62 = arith.truncf %61 : vector<2x8x32xf32> to vector<2x8x32xbf16>
    %cst_40 = arith.constant dense<0.000000e+00> : vector<2x8x32xf32>
    %63 = tpu.matmul %62, %13, %cst_40 {dimension_numbers = #tpu.dot_dimension_numbers<[2], [1], [1], [2], [0, 0, 0, 1, 1, 2], [0], [0]>} : vector<2x8x32xbf16>, vector<2x32x32xbf16>, vector<2x8x32xf32> -> vector<2x8x32xf32>
    %64 = arith.addf %63, %28 : vector<2x8x32xf32>
    %cst_41 = arith.constant 0.000000e+00 : f32
    %65 = vector.broadcast %cst_41 : f32 to vector<2x8x32xf32>
    %66 = arith.maximumf %64, %65 : vector<2x8x32xf32>
    %67 = arith.truncf %66 : vector<2x8x32xf32> to vector<2x8x32xbf16>
    %cst_42 = arith.constant dense<0.000000e+00> : vector<2x8x32xf32>
    %68 = tpu.matmul %67, %7, %cst_42 {dimension_numbers = #tpu.dot_dimension_numbers<[2], [1], [1], [2], [0, 0, 0, 1, 1, 2], [0], [0]>} : vector<2x8x32xbf16>, vector<2x32x32xbf16>, vector<2x8x32xf32> -> vector<2x8x32xf32>
    %69 = arith.addf %68, %19 : vector<2x8x32xf32>
    %70 = math.tanh %69 : vector<2x8x32xf32>
    %71 = arith.truncf %66 : vector<2x8x32xf32> to vector<2x8x32xbf16>
    %cst_43 = arith.constant dense<0.000000e+00> : vector<2x8x32xf32>
    %72 = tpu.matmul %71, %9, %cst_43 {dimension_numbers = #tpu.dot_dimension_numbers<[2], [1], [1], [2], [0, 0, 0, 1, 1, 2], [0], [0]>} : vector<2x8x32xbf16>, vector<2x32x32xbf16>, vector<2x8x32xf32> -> vector<2x8x32xf32>
    %73 = arith.addf %72, %22 : vector<2x8x32xf32>
    %74 = math.tanh %73 : vector<2x8x32xf32>
    %75 = arith.truncf %66 : vector<2x8x32xf32> to vector<2x8x32xbf16>
    %cst_44 = arith.constant dense<0.000000e+00> : vector<2x8x32xf32>
    %76 = tpu.matmul %75, %11, %cst_44 {dimension_numbers = #tpu.dot_dimension_numbers<[2], [1], [1], [2], [0, 0, 0, 1, 1, 2], [0], [0]>} : vector<2x8x32xbf16>, vector<2x32x32xbf16>, vector<2x8x32xf32> -> vector<2x8x32xf32>
    %77 = arith.addf %76, %25 : vector<2x8x32xf32>
    %78 = math.tanh %77 : vector<2x8x32xf32>
    %79 = arith.truncf %70 : vector<2x8x32xf32> to vector<2x8x32xbf16>
    %80 = arith.truncf %74 : vector<2x8x32xf32> to vector<2x8x32xbf16>
    %cst_45 = arith.constant dense<0.000000e+00> : vector<2x8x8xf32>
    %81 = tpu.matmul %79, %80, %cst_45 {dimension_numbers = #tpu.dot_dimension_numbers<[2], [2], [1], [1], [0, 0, 0, 1, 1, 1], [0], [0]>} : vector<2x8x32xbf16>, vector<2x8x32xbf16>, vector<2x8x8xf32> -> vector<2x8x8xf32>
    %cst_46 = arith.constant dense<0xFF800000> : vector<2x8xf32>
    %82 = vector.multi_reduction <maximumf>, %81, %cst_46 [2] : vector<2x8x8xf32> to vector<2x8xf32>
    %83 = vector.shape_cast %82 : vector<2x8xf32> to vector<2x8x1xf32>
    %84 = vector.broadcast %83 : vector<2x8x1xf32> to vector<2x8x8xf32>
    %85 = arith.subf %81, %84 : vector<2x8x8xf32>
    %86 = math.exp %85 : vector<2x8x8xf32>
    %cst_47 = arith.constant dense<0.000000e+00> : vector<2x8xf32>
    %87 = vector.multi_reduction <add>, %86, %cst_47 [2] : vector<2x8x8xf32> to vector<2x8xf32>
    %88 = vector.shape_cast %87 : vector<2x8xf32> to vector<2x8x1xf32>
    %89 = tpu.reciprocal %88 {approx = true} : vector<2x8x1xf32> -> vector<2x8x1xf32>
    %90 = vector.broadcast %89 : vector<2x8x1xf32> to vector<2x8x8xf32>
    %91 = arith.mulf %86, %90 : vector<2x8x8xf32>
    %92 = arith.truncf %91 : vector<2x8x8xf32> to vector<2x8x8xbf16>
    %93 = arith.truncf %78 : vector<2x8x32xf32> to vector<2x8x32xbf16>
    %cst_48 = arith.constant dense<0.000000e+00> : vector<2x8x32xf32>
    %94 = tpu.matmul %92, %93, %cst_48 {dimension_numbers = #tpu.dot_dimension_numbers<[2], [1], [1], [2], [0, 0, 0, 1, 1, 2], [0], [0]>} : vector<2x8x8xbf16>, vector<2x8x32xbf16>, vector<2x8x32xf32> -> vector<2x8x32xf32>
    %95 = arith.truncf %94 : vector<2x8x32xf32> to vector<2x8x32xbf16>
    %cst_49 = arith.constant dense<0.000000e+00> : vector<2x8x32xf32>
    %96 = tpu.matmul %95, %13, %cst_49 {dimension_numbers = #tpu.dot_dimension_numbers<[2], [1], [1], [2], [0, 0, 0, 1, 1, 2], [0], [0]>} : vector<2x8x32xbf16>, vector<2x32x32xbf16>, vector<2x8x32xf32> -> vector<2x8x32xf32>
    %97 = arith.addf %96, %28 : vector<2x8x32xf32>
    %cst_50 = arith.constant 0.000000e+00 : f32
    %98 = vector.broadcast %cst_50 : f32 to vector<2x8x32xf32>
    %99 = arith.maximumf %97, %98 : vector<2x8x32xf32>
    %100 = vector.extract_strided_slice %99 {offsets = [0, 0, 0], sizes = [1, 8, 32], strides = [1, 1, 1]} : vector<2x8x32xf32> to vector<1x8x32xf32>
    %101 = vector.shape_cast %100 : vector<1x8x32xf32> to vector<8x32xf32>
    %102 = vector.extract_strided_slice %99 {offsets = [1, 0, 0], sizes = [1, 8, 32], strides = [1, 1, 1]} : vector<2x8x32xf32> to vector<1x8x32xf32>
    %103 = vector.shape_cast %102 : vector<1x8x32xf32> to vector<8x32xf32>
    %104 = tpu.concatenate %101, %103 in 1 : vector<8x32xf32>, vector<8x32xf32> -> vector<8x64xf32>
    %c0_51 = arith.constant 0 : index
    %c0_52 = arith.constant 0 : index
    %c0_53 = arith.constant 0 : index
    %105 = vector.load %arg12[%c0_51, %c0_52, %c0_53] : memref<1x8x64xf32, #tpu.memory_space<vmem>>, vector<1x8x64xf32>
    %106 = vector.shape_cast %105 : vector<1x8x64xf32> to vector<8x64xf32>
    %107 = vector.shape_cast %104 : vector<8x64xf32> to vector<1x8x64xf32>
    tpu.vector_store %arg12[%c0_51, %c0_52, %c0_53], %107 {strides = array<i32>} : memref<1x8x64xf32, #tpu.memory_space<vmem>>, vector<1x8x64xf32>,
    return
  }
  func.func @transform_0(%arg0: i32) -> (i32, i32, i32) {
    %c0_i32 = arith.constant 0 : i32
    %c0_i32_0 = arith.constant 0 : i32
    %c0_i32_1 = arith.constant 0 : i32
    return %arg0, %c0_i32, %c0_i32_0 : i32, i32, i32
  }
  func.func @transform_1(%arg0: i32) -> (i32, i32, i32) {
    %c0_i32 = arith.constant 0 : i32
    %c0_i32_0 = arith.constant 0 : i32
    %c0_i32_1 = arith.constant 0 : i32
    %c0_i32_2 = arith.constant 0 : i32
    return %c0_i32, %c0_i32_0, %c0_i32_1 : i32, i32, i32
  }
  func.func @transform_2(%arg0: i32) -> (i32, i32, i32) {
    %c0_i32 = arith.constant 0 : i32
    %c0_i32_0 = arith.constant 0 : i32
    %c0_i32_1 = arith.constant 0 : i32
    %c0_i32_2 = arith.constant 0 : i32
    return %c0_i32, %c0_i32_0, %c0_i32_1 : i32, i32, i32
  }
  func.func @transform_3(%arg0: i32) -> (i32, i32, i32) {
    %c0_i32 = arith.constant 0 : i32
    %c0_i32_0 = arith.constant 0 : i32
    %c0_i32_1 = arith.constant 0 : i32
    %c0_i32_2 = arith.constant 0 : i32
    return %c0_i32, %c0_i32_0, %c0_i32_1 : i32, i32, i32
  }
  func.func @transform_4(%arg0: i32) -> (i32, i32, i32) {
    %c0_i32 = arith.constant 0 : i32
    %c0_i32_0 = arith.constant 0 : i32
    %c0_i32_1 = arith.constant 0 : i32
    %c0_i32_2 = arith.constant 0 : i32
    return %c0_i32, %c0_i32_0, %c0_i32_1 : i32, i32, i32
  }
  func.func @transform_5(%arg0: i32) -> (i32, i32, i32) {
    %c0_i32 = arith.constant 0 : i32
    %c0_i32_0 = arith.constant 0 : i32
    %c0_i32_1 = arith.constant 0 : i32
    %c0_i32_2 = arith.constant 0 : i32
    return %c0_i32, %c0_i32_0, %c0_i32_1 : i32, i32, i32
  }
  func.func @transform_6(%arg0: i32) -> (i32, i32, i32) {
    %c0_i32 = arith.constant 0 : i32
    %c0_i32_0 = arith.constant 0 : i32
    %c0_i32_1 = arith.constant 0 : i32
    %c0_i32_2 = arith.constant 0 : i32
    return %c0_i32, %c0_i32_0, %c0_i32_1 : i32, i32, i32
  }
  func.func @transform_7(%arg0: i32) -> (i32, i32, i32) {
    %c0_i32 = arith.constant 0 : i32
    %c0_i32_0 = arith.constant 0 : i32
    %c0_i32_1 = arith.constant 0 : i32
    %c0_i32_2 = arith.constant 0 : i32
    return %c0_i32, %c0_i32_0, %c0_i32_1 : i32, i32, i32
  }
  func.func @transform_8(%arg0: i32) -> (i32, i32, i32) {
    %c0_i32 = arith.constant 0 : i32
    %c0_i32_0 = arith.constant 0 : i32
    %c0_i32_1 = arith.constant 0 : i32
    %c0_i32_2 = arith.constant 0 : i32
    return %c0_i32, %c0_i32_0, %c0_i32_1 : i32, i32, i32
  }
  func.func @transform_9(%arg0: i32) -> (i32, i32, i32) {
    %c0_i32 = arith.constant 0 : i32
    %c0_i32_0 = arith.constant 0 : i32
    %c0_i32_1 = arith.constant 0 : i32
    %c0_i32_2 = arith.constant 0 : i32
    return %c0_i32, %c0_i32_0, %c0_i32_1 : i32, i32, i32
  }
  func.func @transform_10(%arg0: i32) -> (i32, i32, i32) {
    %c0_i32 = arith.constant 0 : i32
    %c0_i32_0 = arith.constant 0 : i32
    %c0_i32_1 = arith.constant 0 : i32
    %c0_i32_2 = arith.constant 0 : i32
    return %c0_i32, %c0_i32_0, %c0_i32_1 : i32, i32, i32
  }
  func.func @transform_11(%arg0: i32) -> (i32, i32, i32) {
    %c0_i32 = arith.constant 0 : i32
    %c0_i32_0 = arith.constant 0 : i32
    %c0_i32_1 = arith.constant 0 : i32
    return %arg0, %c0_i32, %c0_i32_0 : i32, i32, i32
  }
}

</mosaic_0001>

<bundles_post_ra>
// kernel: tpu_custom_call.1
= control target key start
LH: loop header
LB: loop body
LE: loop exit
PB: predicated region body
PF: predicated region fallthrough
CT: control target
= control target key end

     0   :  { %s2034_s0 = inlined_call_operand.vmem [shape: f32[2,8,4], index: 0, kind: input, shape index: {}]   ;;  %s2035_s1 = inlined_call_operand.vmem [shape: f32[2,4,32], index: 1, kind: input, shape index: {}]   ;;  %s2036_s2 = inlined_call_operand.vmem [shape: f32[2,1,32], index: 2, kind: input, shape index: {}]   ;;  %s2037_s3 = inlined_call_operand.hbm [shape: f32[2,32,32], index: 3, kind: input, shape index: {}]   ;;  %s2038_s4 = inlined_call_operand.vmem [shape: f32[2,1,32], index: 4, kind: input, shape index: {}]   ;;  %s2039_s5 = inlined_call_operand.hbm [shape: f32[2,32,32], index: 5, kind: input, shape index: {}]   ;;  %s2040_s6 = inlined_call_operand.vmem [shape: f32[2,1,32], index: 6, kind: input, shape index: {}]   ;;  %s2041_s7 = inlined_call_operand.hbm [shape: f32[2,32,32], index: 7, kind: input, shape index: {}]   ;;  %s2042_s8 = inlined_call_operand.vmem [shape: f32[2,1,32], index: 8, kind: input, shape index: {}]   ;;  %s2043_s9 = inlined_call_operand.hbm [shape: f32[2,32,32], index: 9, kind: input, shape index: {}]   ;;  %s2044_s10 = inlined_call_operand.vmem [shape: f32[2,1,32], index: 10, kind: input, shape index: {}]   ;;  %s2045_s11 = inlined_call_operand.hbm [shape: f32[2,8,64], index: 11, kind: output, shape index: {}]  }
   0x1   :  { %2051 = sst [smem:[#allocation20_spill]] %s2037_s3 }
   0x2   :  { %2052 = sst [smem:[#allocation21_spill]] %s2039_s5 }
   0x3   :  { %16 = vsyncpa [#allocation3], 0 }
   0x4   :  { %17 = vsyncpa [#allocation6], 0 }
   0x5   :  { %18 = vsyncpa [#allocation9], 0 }
   0x6   :  { %19 = vsyncpa [#allocation4], 0 }
   0x7   :  { %21 = vsyncpa [#allocation4 + $0x1], 0  ;;  %s1729_s17 = smov 0   ;;  %s1731_s18 = smov 0  }
   0x8   :  { %s1733_s19 = smov 0   ;;  %s1735_s20 = smov 0  }
   0x9 LB: > { %2053 = sst [smem:[#allocation15_spill]] %s1648_s17  ;;  %s1750_s21 = sadd.s32 4294967295, %s1660_s20   ;;  %s1660_s20 = sphi %s1735_s20, %s2066_s20   ;;  %s1656_s19 = sphi %s1733_s19, %s2068_s19   ;;  %s1652_s18 = sphi %s1731_s18, %s2070_s18   ;;  %s1648_s17 = sphi %s1729_s17, %s2069_s17  }
   0xa   : > { %2054 = sst [smem:[#allocation16_spill]] %s1656_s19  ;;  %s1289_s22 = sadd.s32 4294967294, %s1660_s20  }
   0xb   : > { %s1754_s23 = sadd.s32 1, %s1660_s20   ;;  %s270_s24 = sadd.s32 1, %s1656_s19 }
   0xc   : > { %2055 = sst [smem:[#allocation17_spill]] %s1754_s23  ;;  %s267_s25 = ssub.s32 %s1660_s20, %s1754_s23 }
   0xd   : > { %p280_p0 = scmp.ne.s32.totalorder %s1656_s19, %s1652_s18  ;;  %p268_p1 = scmp.eq.s32.totalorder %s267_s25, 0 }
   0xe   : > { %p281_p2 = scmp.eq.s32.totalorder %s1750_s21, 1  ;;  %p286_p3 = scmp.ne.s32.totalorder %s1652_s18, %s1648_s17 }
   0xf   : > { %p287_p4 = scmp.eq.s32.totalorder %s1289_s22, 1  ;;  %p1290_p7 = scmp.ge.s32.totalorder %s1660_s20, 1 }
  0x10   : > { %s1765_s26 = scalar_select %p268_p1, %s1656_s19, %s270_s24  }
  0x11   : > { %p1767_p5 = por %p281_p2, %p280_p0  ;;  %p1771_p6 = por %p287_p4, %p286_p3 }
  0x12   : > { %2056 = sst [smem:[#allocation18_spill]] %s1765_s26  ;;  %p294_p8 = scmp.lt.s32.totalorder %s1660_s20, 3 }
  0x13   : > { %s2058_s28 = scalar_select %p1771_p6, 1, 0 }
  0x14   : > { %p1368_p9 = scmp.eq.s32.totalorder %s1750_s21, 0  ;;  %p1778_p10 = pnand %p1290_p7, %p294_p8 }
  0x15   : > { %2059 = sst [smem:[#allocation19_spill]] %s2058_s28  ;;  %s1662_s24 = smov [#allocation5]  }
  0x16   : > { %s2061_s5 = sld [smem:[#allocation21_spill]]  ;;  %p1351_p11 = pneg %p1778_p10 }
  0x17   : > { %s2062_s3 = sld [smem:[#allocation20_spill]]  ;;  %s330_s25 = sshll.u32 %s1662_s24, 4  ;;  %s331_s25 = int_to_ptr.vmem [resolvable:$true] %s330_s25 }
  0x18   : > { %p1792_p12 = pnand %p1368_p9, %p1351_p11  ;;  %s1663_s30 = smov 128  }
  0x19   : > { %s1664_s12 = smov 8   ;;  %s345_s26 = sshll.u32 %s2041_s7, 4  ;;  %s346_s26 = int_to_ptr.hbm [resolvable:$true] %s345_s26 }
  0x1a   : > { %s362_s23 = sshll.u32 %s2043_s9, 4  ;;  %s1666_s28 = smov [#allocation7]   ;;  %s363_s23 = int_to_ptr.hbm [resolvable:$true] %s362_s23 }
  0x1b   : > { %s347_s17 = sshll.u32 %s1666_s28, 4  ;;  %s348_s17 = int_to_ptr.vmem [resolvable:$true] %s347_s17 }
  0x1c   : > { %s328_s13 = sshll.u32 %s2061_s5, 4  ;;  %s1665_s5 = smov [#allocation2]   ;;  %s329_s13 = int_to_ptr.hbm [resolvable:$true] %s328_s13 }
  0x1d   : > { %s311_s16 = sshll.u32 %s2062_s3, 4  ;;  %s313_s14 = sshll.u32 %s1665_s5, 4  ;;  %s312_s16 = int_to_ptr.hbm [resolvable:$true] %s311_s16  ;;  %s314_s14 = int_to_ptr.vmem [resolvable:$true] %s313_s14 }
  0x1e   : > { %1357 = dma.hbm_to_vmem [thread:$0]  (!%p1792_p12), %s329_s13, 1024, %s331_s25, [#allocation6], %s1663_s30, %s1663_s30, %s1664_s12  }
  0x1f   : > { %1354 = dma.hbm_to_vmem [thread:$0]  (!%p1792_p12), %s312_s16, 1024, %s314_s14, [#allocation3], %s1663_s30, %s1663_s30, %s1664_s12  }
  0x20   : > { %1360 = dma.hbm_to_vmem [thread:$0]  (!%p1792_p12), %s346_s26, 1024, %s348_s17, [#allocation6], %s1663_s30, %s1663_s30, %s1664_s12  }
  0x21   : > { %s1667_s13 = smov [#allocation8]   ;;  %390 = sbr.rel (%p1778_p10) target bundleno = 1863 (0x747), region = 64 }
  0x22   : > { %s364_s5 = sshll.u32 %s1667_s13, 4  ;;  %s365_s5 = int_to_ptr.vmem [resolvable:$true] %s364_s5 }
  0x23   : > { %1363 = dma.hbm_to_vmem [thread:$0]  (!%p1792_p12), %s363_s23, 1024, %s365_s5, [#allocation9], %s1663_s30, %s1663_s30, %s1664_s12  }
  0x26   : > { %1631 = dma.done.wait (%p1368_p9), [#allocation3], 1024  }
  0x27   : > { %1633 = vsyncadd (%p1368_p9), [#allocation3], 4294966272 }
  0x28   : > { %1635 = dma.done.wait (%p1368_p9), [#allocation6], 2048  }
  0x29   : > { %1637 = vsyncadd (%p1368_p9), [#allocation6], 4294965248 }
  0x2a   : > { %1639 = dma.done.wait (%p1368_p9), [#allocation9], 1024  }
  0x2b   : > { %1641 = vsyncadd (%p1368_p9), [#allocation9], 4294966272  ;;  %p445_p13 = scmp.lt.s32.totalorder %s1750_s21, 1  ;;  %v452_v0 = vld [vmem:[%s2035_s1 + $0x4] sm:$0xf]  ;;  %vm564_vm0 = vcmask 1041408  }
  0x2c   : > { %v451_v2 = vld [vmem:[%s2035_s1] sm:$0xf]  ;;  %v454_v3 = vpack.c.bf16 %v452_v0, %v452_v0  ;;  %vm560_vm1 = vcmask 31744   ;;  %v461_v8 = vld [vmem:[#allocation2 + $0x30] sm:$0xff]  ;;  %v462_v9 = vld [vmem:[#allocation2 + $0x38] sm:$0xff]  ;;  %vm613_vm2 = vcmask 261120  }
  0x2d   : > { %s446_s3 = scalar_select %p445_p13, %s1750_s21, 1  ;;  %v453_v4 = vpack.c.bf16 %v451_v2, %v451_v2  ;;  %v477_v10 = vld [vmem:[#allocation5 + $0x30] sm:$0xff]  ;;  %v469_v11 = vpack.c.bf16 %v461_v8, %v461_v8  ;;  %v470_v12 = vpack.c.bf16 %v462_v9, %v462_v9  ;;  %v478_v13 = vld [vmem:[#allocation5 + $0x38] sm:$0xff]  ;;  %v459_v20 = vld [vmem:[#allocation2 + $0x20] sm:$0xff]  ;;  %vm836_vm3 = vcmask 1043456  }
  0x2e   : > { %v582_v5 = vsel %vm564_vm0, %v454_v3, 0  ;;  %v485_v14 = vpack.c.bf16 %v477_v10, %v477_v10  ;;  %v486_v15 = vpack.c.bf16 %v478_v13, %v478_v13  ;;  %v460_v21 = vld [vmem:[#allocation2 + $0x28] sm:$0xff]  ;;  %v475_v22 = vld [vmem:[#allocation5 + $0x20] sm:$0xff]  ;;  %v467_v24 = vpack.c.bf16 %v459_v20, %v459_v20  ;;  %v473_v34 = vld [vmem:[#allocation5 + $0x10] sm:$0xff]  ;;  %s1668_s14 = smov 32   ;;  %s442_s15 = sand.u32 1, %s1652_s18  }
  0x2f   : > { %s1302_s17 = sshll.u32 %s446_s3, 3  ;;  %v566_v7 = vsel %vm564_vm0, %v453_v4, 0  ;;  %591 = vmatpush.bf16.msra.mxu1 %v582_v5  ;;  %v636_v16 = vunpack.c.l.b16 %v469_v11  ;;  %v637_v17 = vunpack.c.l.b16 %v470_v12  ;;  %v468_v25 = vpack.c.bf16 %v460_v21, %v460_v21  ;;  %v476_v26 = vld [vmem:[#allocation5 + $0x28] sm:$0xff]  ;;  %v474_v35 = vld [vmem:[#allocation5 + $0x18] sm:$0xff]  ;;  %v457_v40 = vld [vmem:[#allocation2 + $0x10] sm:$0xff]  ;;  %s1301_s24 = sshll.u32 %s442_s15, 3 }
  0x30   : > { %s448_s26 = scalar_lea.vmem %s2034_s0, %s1302_s17  ;;  %575 = vmatpush.bf16.msra.mxu0 %v566_v7  ;;  %v691_v18 = vunpack.c.l.b16 %v485_v14  ;;  %v692_v19 = vunpack.c.l.b16 %v486_v15  ;;  %v483_v27 = vpack.c.bf16 %v475_v22, %v475_v22  ;;  %v484_v29 = vpack.c.bf16 %v476_v26, %v476_v26  ;;  %v458_v41 = vld [vmem:[#allocation2 + $0x18] sm:$0xff]  ;;  %v471_v46 = vld [vmem:[#allocation5] sm:$0xff]  ;;  %v472_v47 = vld [vmem:[#allocation5 + $0x8] sm:$0xff]  ;;  %s1330_s13 = sshll.u32 %s1750_s21, 3 }
  0x31   : > { %v450_v1 = vld [vmem:[%s448_s26] sm:$0xff]  ;;  %v1835_v23 = vpack.c.b16 %v637_v17, %v636_v16  ;;  %v634_v30 = vunpack.c.l.b16 %v467_v24  ;;  %v635_v31 = vunpack.c.l.b16 %v468_v25  ;;  %v481_v37 = vpack.c.bf16 %v473_v34, %v473_v34  ;;  %v456_v54 = vld [vmem:[#allocation2 + $0x8] sm:$0xff]  ;;  %v493_v59 = vld [vmem:[#allocation7 + $0x30] sm:$0xff]  ;;  %s1184_s17 = scalar_lea.hbm %s2045_s11, %s1330_s13  ;;  %s444_s19 = scalar_lea.vmem [#allocation10], %s1301_s24 }
  0x32   : > { %v559_v6 = vpack.c.bf16 %v450_v1, %v450_v1  ;;  %v1837_v28 = vpack.c.b16 %v692_v19, %v691_v18  ;;  %v689_v32 = vunpack.c.l.b16 %v483_v27  ;;  %v690_v33 = vunpack.c.l.b16 %v484_v29  ;;  %v455_v53 = vld [vmem:[#allocation2] sm:$0xff]  ;;  %v494_v60 = vld [vmem:[#allocation7 + $0x38] sm:$0xff]  ;;  %v492_v1 = vld [vmem:[#allocation7 + $0x28] sm:$0xff]  ;;  %s1186_s23 = sshll.u32 %s444_s19, 4  ;;  %s1188_s26 = sshll.u32 %s1184_s17, 4  ;;  %s1187_s23 = int_to_ptr.vmem [resolvable:$true] %s1186_s23  ;;  %s1189_s26 = int_to_ptr.hbm [resolvable:$true] %s1188_s26 }
  0x33   : > { %651 = vmatpush.bf16.msra.mxu3 %v1835_v23  ;;  %v1841_v36 = vpack.c.b16 %v635_v31, %v634_v30  ;;  %v482_v38 = vpack.c.bf16 %v474_v35, %v474_v35  ;;  %v666_v42 = vunpack.c.l.b16 %v481_v37  ;;  %v465_v44 = vpack.c.bf16 %v457_v40, %v457_v40  ;;  %v491_v61 = vld [vmem:[#allocation7 + $0x20] sm:$0xff]  ;;  %v489_v14 = vld [vmem:[#allocation7 + $0x10] sm:$0xff]  ;;  %v490_v15 = vld [vmem:[#allocation7 + $0x18] sm:$0xff]  ;;  %s1174_s28 = scalar_lea.sflag [#allocation4], %s442_s15  ;;  %s1600_s21 = sshra.s32 %s1189_s26, 4  ;;  %s1601_s21 = int_to_ptr.hbm [resolvable:$true] %s1600_s21 }
  0x34   : > { %1304 = vmatmul.msk.bf16.vlgmr.msra.gmra.mxu1 %vm560_vm1, %v559_v6  ;;  %1303 = vmatmul.msk.bf16.vlgmr.msra.gmra.mxu0 %vm560_vm1, %v559_v6  ;;  %v1843_v39 = vpack.c.b16 %v690_v33, %v689_v32  ;;  %v466_v45 = vpack.c.bf16 %v458_v41, %v458_v41  ;;  %v479_v51 = vpack.c.bf16 %v471_v46, %v471_v46  ;;  %v487_v16 = vld [vmem:[#allocation7] sm:$0xff]  ;;  %v488_v19 = vld [vmem:[#allocation7 + $0x8] sm:$0xff]  ;;  %vm806_vm4 = vcmask 64512   ;;  %s1602_s29 = scalar_lea.hbm %s1601_s21, 8  ;;  %s1606_s25 = scalar_lea.hbm %s2045_s11, 16 }
  0x35   : > { %703 = vmatpush.bf16.msrb.mxu1 %v1837_v28  ;;  %v667_v43 = vunpack.c.l.b16 %v482_v38  ;;  %v607_v49 = vunpack.c.l.b16 %v465_v44  ;;  %v480_v52 = vpack.c.bf16 %v472_v47, %v472_v47  ;;  %v463_v57 = vpack.c.bf16 %v455_v53, %v455_v53  ;;  %v1416_v29 = vld [vmem:[%s2036_s2 + $0x1] ss:$0 sm:$0xff]  ;;  %v1417_v30 = vld [vmem:[%s2036_s2] ss:$0 sm:$0xff]  ;;  %p1603_p0 = scmp.ne.s32.totalorder %s1601_s21, %s1602_s29  ;;  %p1607_p3 = scmp.lt.s32.totalorder %s1601_s21, %s2045_s11 }
  0x36   : > { %v608_v50 = vunpack.c.l.b16 %v466_v45  ;;  %v664_v56 = vunpack.c.l.b16 %v479_v51  ;;  %v464_v58 = vpack.c.bf16 %v456_v54, %v456_v54  ;;  %v501_v63 = vpack.c.bf16 %v493_v59, %v493_v59  ;;  %v1886_v44 = vld [vmem:[%s2040_s6 + $0x1] ss:$0 sm:$0xff]  ;;  %v1891_v45 = vld [vmem:[%s2040_s6] ss:$0 sm:$0xff]  ;;  %p1608_p4 = scmp.lt.s32.totalorder %s1606_s25, %s1602_s29 }
  0x37   : > { %652 = vmatpush.bf16.msra.mxu3 %v1841_v36  ;;  %v1847_v48 = vpack.c.b16 %v667_v43, %v666_v42  ;;  %v665_v62 = vunpack.c.l.b16 %v480_v52  ;;  %v502_v0 = vpack.c.bf16 %v494_v60, %v494_v60  ;;  %v499_v2 = vpack.c.bf16 %v491_v61, %v491_v61  ;;  %v1898_v51 = vld [vmem:[%s2038_s4 + $0x1] ss:$0 sm:$0xff]  ;;  %v1903_v52 = vld [vmem:[%s2038_s4] ss:$0 sm:$0xff]  ;;  %p1604_p1 = pnand %p1603_p0, %p1767_p5 }
  0x38   : > { %v1850_v55 = vpack.c.b16 %v608_v50, %v607_v49  ;;  %v605_v3 = vunpack.c.l.b16 %v463_v57  ;;  %v606_v4 = vunpack.c.l.b16 %v464_v58  ;;  %v500_v5 = vpack.c.bf16 %v492_v1, %v492_v1  ;;  %p1609_p7 = por %p1608_p4, %p1607_p3 }
  0x39   : > { %704 = vmatpush.bf16.msrb.mxu1 %v1843_v39  ;;  %678 = vmatpush.bf16.msrb.mxu0 %v1847_v48  ;;  %v1853_v6 = vpack.c.b16 %v665_v62, %v664_v56  ;;  %v743_v7 = vunpack.c.l.b16 %v501_v63  ;;  %v744_v8 = vunpack.c.l.b16 %v502_v0  ;;  %v741_v9 = vunpack.c.l.b16 %v499_v2  ;;  %p1605_p2 = pneg %p1604_p1 }
  0x3a   : > { %623 = vmatpush.bf16.msra.mxu2 %v1850_v55  ;;  %v1855_v10 = vpack.c.b16 %v606_v4, %v605_v3  ;;  %v742_v11 = vunpack.c.l.b16 %v500_v5  ;;  %v497_v17 = vpack.c.bf16 %v489_v14, %v489_v14  ;;  %v498_v18 = vpack.c.bf16 %v490_v15, %v490_v15 }
  0x3b   : > { %v1858_v12 = vpack.c.b16 %v744_v8, %v743_v7  ;;  %v495_v20 = vpack.c.bf16 %v487_v16, %v487_v16  ;;  %v496_v21 = vpack.c.bf16 %v488_v19, %v488_v19  ;;  %vm1171_vm5 = vcmask 523264   ;;  %p1610_p8 = pnand %p1609_p7, %p1605_p2 }
  0x3c   : > { %v1862_v13 = vpack.c.b16 %v742_v11, %v741_v9  ;;  %v718_v22 = vunpack.c.l.b16 %v497_v17  ;;  %v719_v24 = vunpack.c.l.b16 %v498_v18  ;;  %v1912_v9 = vld [vmem:[%s2042_s8 + $0x1] ss:$0 sm:$0xff]  ;;  %v1918_v11 = vld [vmem:[%s2042_s8] ss:$0 sm:$0xff] }
  0x3d   : > { %679 = vmatpush.bf16.msrb.mxu0 %v1853_v6  ;;  %755 = vmatpush.bf16.msrb.mxu3 %v1858_v12  ;;  %v716_v25 = vunpack.c.l.b16 %v495_v20  ;;  %v717_v26 = vunpack.c.l.b16 %v496_v21 }
  0x3e   : > { %624 = vmatpush.bf16.msra.mxu2 %v1855_v10  ;;  %v1865_v27 = vpack.c.b16 %v719_v24, %v718_v22 }
  0x3f   : > { %v1874_v31 = vpack.c.b16 %v717_v26, %v716_v25 }
  0x41   : > { %756 = vmatpush.bf16.msrb.mxu3 %v1862_v13 }
  0x42   : > { %730 = vmatpush.bf16.msrb.mxu2 %v1865_v27 }
  0x46   : > { %731 = vmatpush.bf16.msrb.mxu2 %v1874_v31 }
  0xb1   : > { %v593_v32 = vpop.f32.mrf.mxu1  ;;  %v577_v33 = vpop.f32.mrf.mxu0 }
  0xb2   : > { %v594_v34 = vadd.f32 %v1416_v29, %v593_v32  ;;  %v578_v35 = vadd.f32 %v1417_v30, %v577_v33 }
  0xb4   : > { %v598_v37 = vmax.f32 %v594_v34, 0.0  ;;  %v597_v38 = vmax.f32 %v578_v35, 0.0 }
  0xb6   : > { %v600_v40 = vpack.c.bf16 %v598_v37, %v598_v37  ;;  %v599_v41 = vpack.c.bf16 %v597_v38, %v597_v38 }
  0xb8   : > { %1306 = vmatmul.msk.bf16.vlgmr.msra.gmra.mxu3 %vm613_vm2, %v600_v40  ;;  %1308 = vmatmul.msk.bf16.vlgmr.msrb.gmra.mxu1 %vm613_vm2, %v600_v40 }
  0xb9   : > { %v595_v42 = vpop.f32.mrf.mxu1  ;;  %1307 = vmatmul.msk.bf16.vlgmr.msrb.gmra.mxu0 %vm613_vm2, %v599_v41  ;;  %1305 = vmatmul.msk.bf16.vlgmr.msra.gmra.mxu2 %vm613_vm2, %v599_v41  ;;  %v579_v43 = vpop.f32.mrf.mxu0 }
  0xc8   : > { %1310 = vmatmul.msk.bf16.vlgmr.msrb.gmra.mxu3 %vm613_vm2, %v600_v40 }
  0xc9   : > { %1309 = vmatmul.msk.bf16.vlgmr.msrb.gmra.mxu2 %vm613_vm2, %v599_v41 }
 0x135   : > { %v706_v46 = vpop.f32.mrf.mxu1 }
 0x136   : > { %v707_v47 = vadd.f32 %v1886_v44, %v706_v46  ;;  %v681_v49 = vpop.f32.mrf.mxu0  ;;  %v509_v46 = vld [vmem:[#allocation8 + $0x30] sm:$0xff] }
 0x137   : > { %v682_v50 = vadd.f32 %v1891_v45, %v681_v49  ;;  %v517_v49 = vpack.c.bf16 %v509_v46, %v509_v46 }
 0x138   : > { %1426 = vtanh.f32 %v707_v47  ;;  %v510_v47 = vld [vmem:[#allocation8 + $0x38] sm:$0xff] }
 0x139   : > { %1428 = vtanh.f32 %v682_v50  ;;  %v518_v50 = vpack.c.bf16 %v510_v47, %v510_v47 }
 0x13b   : > { %v654_v53 = vpop.f32.mrf.mxu3 }
 0x13c   : > { %v655_v54 = vadd.f32 %v1898_v51, %v654_v53  ;;  %v626_v56 = vpop.f32.mrf.mxu2  ;;  %v908_v53 = vunpack.c.l.b16 %v517_v49 }
 0x13d   : > { %v708_v57 = vpop.f32.mrf.mxu1  ;;  %v627_v58 = vadd.f32 %v1903_v52, %v626_v56 }
 0x13e   : > { %v1427_v59 = vpop.eup %1426  ;;  %1430 = vtanh.f32 %v655_v54  ;;  %v683_v60 = vpop.f32.mrf.mxu0  ;;  %v909_v54 = vunpack.c.l.b16 %v518_v50 }
 0x13f   : > { %v1429_v61 = vpop.eup %1428  ;;  %v767_v62 = vpack.c.bf16 %v1427_v59, %v1427_v59  ;;  %1432 = vtanh.f32 %v627_v58 }
 0x140   : > { %v766_v63 = vpack.c.bf16 %v1429_v61, %v1429_v61  ;;  %v1933_v56 = vpack.c.b16 %v909_v54, %v908_v53 }
 0x141   : > { %v791_v0 = vsel %vm613_vm2, %v767_v62, 0 }
 0x142   : > { %800 = vmatpush.bf16.xpose.msra.mxu1 %v791_v0  ;;  %v772_v1 = vsel %vm613_vm2, %v766_v63, 0 }
 0x143   : > { %v656_v2 = vpop.f32.mrf.mxu3  ;;  %781 = vmatpush.bf16.xpose.msra.mxu0 %v772_v1  ;;  %v507_v1 = vld [vmem:[#allocation8 + $0x20] sm:$0xff] }
 0x144   : > { %v1431_v3 = vpop.eup %1430  ;;  %v628_v4 = vpop.f32.mrf.mxu2  ;;  %v508_v2 = vld [vmem:[#allocation8 + $0x28] sm:$0xff] }
 0x145   : > { %v1433_v5 = vpop.eup %1432  ;;  %v765_v8 = vpack.c.bf16 %v1431_v3, %v1431_v3  ;;  %v515_v3 = vpack.c.bf16 %v507_v1, %v507_v1  ;;  %v516_v4 = vpack.c.bf16 %v508_v2, %v508_v2 }
 0x146   : > { %v764_v7 = vpack.c.bf16 %v1433_v5, %v1433_v5 }
 0x147   : > { %v906_v5 = vunpack.c.l.b16 %v515_v3 }
 0x149   : > { %1312 = vmatmul.msk.bf16.vlgmr.msra.gmra.mxu1 %vm613_vm2, %v765_v8  ;;  %v505_v8 = vld [vmem:[#allocation8 + $0x10] sm:$0xff] }
 0x14a   : > { %1311 = vmatmul.msk.bf16.vlgmr.msra.gmra.mxu0 %vm613_vm2, %v764_v7  ;;  %923 = vmatpush.bf16.msrb.mxu1 %v1933_v56  ;;  %v907_v7 = vunpack.c.l.b16 %v516_v4 }
 0x14b   : > { %v758_v14 = vpop.f32.mrf.mxu3 }
 0x14c   : > { %v759_v15 = vadd.f32 %v1912_v9, %v758_v14  ;;  %v733_v16 = vpop.f32.mrf.mxu2  ;;  %v506_v14 = vld [vmem:[#allocation8 + $0x18] sm:$0xff] }
 0x14d   : > { %v734_v17 = vadd.f32 %v1918_v11, %v733_v16  ;;  %v514_v16 = vpack.c.bf16 %v506_v14, %v506_v14 }
 0x14e   : > { %1434 = vtanh.f32 %v759_v15  ;;  %v513_v15 = vpack.c.bf16 %v505_v8, %v505_v8 }
 0x14f   : > { %1436 = vtanh.f32 %v734_v17  ;;  %v881_v17 = vunpack.c.l.b16 %v514_v16 }
 0x153   : > { %v760_v18 = vpop.f32.mrf.mxu3 }
 0x154   : > { %v1435_v19 = vpop.eup %1434  ;;  %v735_v20 = vpop.f32.mrf.mxu2  ;;  %v503_v18 = vld [vmem:[#allocation8] sm:$0xff] }
 0x155   : > { %v1437_v21 = vpop.eup %1436  ;;  %v832_v22 = vpack.c.bf16 %v1435_v19, %v1435_v19  ;;  %v511_v19 = vpack.c.bf16 %v503_v18, %v503_v18 }
 0x156   : > { %v831_v24 = vpack.c.bf16 %v1437_v21, %v1437_v21 }
 0x157   : > { %v857_v25 = vsel %vm836_vm3, %v832_v22, 0  ;;  %v878_v21 = vunpack.c.l.b16 %v511_v19 }
 0x158   : > { %866 = vmatpush.bf16.msra.mxu3 %v857_v25  ;;  %v838_v26 = vsel %vm836_vm3, %v831_v24, 0 }
 0x159   : > { %847 = vmatpush.bf16.msra.mxu2 %v838_v26 }
 0x15c   : > { %959 = vmatpush.bf16.msrb.mxu3 %v1835_v23 }
 0x15d   : > { %943 = vmatpush.bf16.msrb.mxu2 %v1850_v55 }
 0x160   : > { %960 = vmatpush.bf16.msrb.mxu3 %v1841_v36 }
 0x161   : > { %944 = vmatpush.bf16.msrb.mxu2 %v1855_v10 }
 0x1c6   : > { %v802_v29 = vpop.f32.mrf.mxu1 }
 0x1c7   : > { %v810_v30 = vsel %vm806_vm4, %v802_v29, -inf  ;;  %v783_v32 = vpop.f32.mrf.mxu0 }
 0x1c8   : > { %811 = vmax.xlane.f32.xlu0 %v810_v30  ;;  %v807_v33 = vsel %vm806_vm4, %v783_v32, -inf }
 0x1ce   : > { %v804_v34 = vpop.f32.mrf.mxu1 }
 0x1cf   : > { %v785_v35 = vpop.f32.mrf.mxu0 }
 0x1d0   : > { %808 = vmax.xlane.f32.xlu0 %v807_v33  ;;  %v1966_v35 = vld [vmem:[%s2044_s10] ss:$0 sm:$0xff] }
 0x23b   : > { %v812_v37 = vpop.xlane.xlu0 %811 }
 0x23c   : > { %v814_v38 = vsub.f32 %v802_v29, %v812_v37 }
 0x23e   : > { %v817_v23 = vmul.f32 1.442695, %v814_v38 }
 0x240   : > { %1438 = vpow2.f32 %v817_v23 }
 0x243   : > { %v809_v55 = vpop.xlane.xlu0 %808 }
 0x244   : > { %v813_v40 = vsub.f32 %v783_v32, %v809_v55 }
 0x246   : > { %v1439_v36 = vpop.eup %1438  ;;  %v815_v41 = vmul.f32 1.442695, %v813_v40 }
 0x247   : > { %v822_v10 = vsel %vm806_vm4, %v1439_v36, 0.0 }
 0x248   : > { %1440 = vpow2.f32 %v815_v41  ;;  %823 = vadd.xlane.f32.xlu1 %v822_v10 }
 0x24e   : > { %v1441_v42 = vpop.eup %1440 }
 0x24f   : > { %v819_v43 = vsel %vm806_vm4, %v1441_v42, 0.0 }
 0x250   : > { %820 = vadd.xlane.f32.xlu1 %v819_v43 }
 0x2bb   : > { %v824_v57 = vpop.xlane.xlu1 %823 }
 0x2bc   : > { %1442 = vrcp.f32 %v824_v57 }
 0x2c2   : > { %v1443_v58 = vpop.eup %1442 }
 0x2c3   : > { %v828_v59 = vmul.f32 %v1443_v58, %v1439_v36  ;;  %v821_v60 = vpop.xlane.xlu1 %820 }
 0x2c4   : > { %1444 = vrcp.f32 %v821_v60 }
 0x2c5   : > { %v830_v61 = vpack.c.bf16 %v828_v59, %v828_v59 }
 0x2c7   : > { %1314 = vmatmul.msk.bf16.vlgmr.msra.gmra.mxu3 %vm806_vm4, %v830_v61 }
 0x2c8   : > { %1015 = vmatpush.bf16.msra.mxu3 %v1858_v12  ;;  %v1942_v12 = vpack.c.b16 %v907_v7, %v906_v5 }
 0x2ca   : > { %v1445_v62 = vpop.eup %1444  ;;  %924 = vmatpush.bf16.msrb.mxu1 %v1942_v12 }
 0x2cb   : > { %v827_v63 = vmul.f32 %v1445_v62, %v1441_v42 }
 0x2cc   : > { %1016 = vmatpush.bf16.msra.mxu3 %v1862_v13  ;;  %v880_v13 = vunpack.c.l.b16 %v513_v15 }
 0x2cd   : > { %v829_v0 = vpack.c.bf16 %v827_v63, %v827_v63 }
 0x2ce   : > { %987 = vmatpush.bf16.msra.mxu1 %v1837_v28 }
 0x2cf   : > { %1313 = vmatmul.msk.bf16.vlgmr.msra.gmra.mxu2 %vm806_vm4, %v829_v0 }
 0x2d0   : > { %1002 = vmatpush.bf16.msra.mxu2 %v1865_v27  ;;  %v504_v27 = vld [vmem:[#allocation8 + $0x8] sm:$0xff] }
 0x2d1   : > { %v512_v20 = vpack.c.bf16 %v504_v27, %v504_v27 }
 0x2d2   : > { %988 = vmatpush.bf16.msra.mxu1 %v1843_v39  ;;  %v1960_v39 = vld [vmem:[%s2044_s10 + $0x1] ss:$0 sm:$0xff] }
 0x2d3   : > { %v879_v22 = vunpack.c.l.b16 %v512_v20 }
 0x2d4   : > { %1003 = vmatpush.bf16.msra.mxu2 %v1874_v31  ;;  %v1946_v31 = vpack.c.b16 %v881_v17, %v880_v13 }
 0x2d5   : > { %v1950_v24 = vpack.c.b16 %v879_v22, %v878_v21 }
 0x2d6   : > { %895 = vmatpush.bf16.msrb.mxu0 %v1946_v31 }
 0x2da   : > { %896 = vmatpush.bf16.msrb.mxu0 %v1950_v24 }
 0x2de   : > { %974 = vmatpush.bf16.msra.mxu0 %v1847_v48 }
 0x2e2   : > { %975 = vmatpush.bf16.msra.mxu0 %v1853_v6 }
 0x34a   : > { %v868_v25 = vpop.f32.mrf.mxu3 }
 0x34b   : > { %v873_v28 = vpack.c.bf16 %v868_v25, %v868_v25 }
 0x34d   : > { %1316 = vmatmul.msk.bf16.vlgmr.msrb.gmra.mxu1 %vm613_vm2, %v873_v28 }
 0x352   : > { %v849_v26 = vpop.f32.mrf.mxu2  ;;  %v870_v29 = vpop.f32.mrf.mxu3 }
 0x353   : > { %v872_v30 = vpack.c.bf16 %v849_v26, %v849_v26 }
 0x355   : > { %1315 = vmatmul.msk.bf16.vlgmr.msrb.gmra.mxu0 %vm613_vm2, %v872_v30 }
 0x35a   : > { %v851_v32 = vpop.f32.mrf.mxu2 }
 0x3ca   : > { %v926_v33 = vpop.f32.mrf.mxu1 }
 0x3cb   : > { %v927_v48 = vadd.f32 %v1960_v39, %v926_v33 }
 0x3cd   : > { %v931_v34 = vmax.f32 %v927_v48, 0.0 }
 0x3cf   : > { %v933_v6 = vpack.c.bf16 %v931_v34, %v931_v34 }
 0x3d1   : > { %1318 = vmatmul.msk.bf16.vlgmr.msrb.gmra.mxu3 %vm613_vm2, %v933_v6  ;;  %1320 = vmatmul.msk.bf16.vlgmr.msra.gmra.mxu1 %vm613_vm2, %v933_v6 }
 0x3d2   : > { %v898_v37 = vpop.f32.mrf.mxu0  ;;  %v928_v38 = vpop.f32.mrf.mxu1 }
 0x3d3   : > { %v899_v23 = vadd.f32 %v1966_v35, %v898_v37 }
 0x3d5   : > { %v930_v55 = vmax.f32 %v899_v23, 0.0 }
 0x3d7   : > { %v932_v40 = vpack.c.bf16 %v930_v55, %v930_v55 }
 0x3d9   : > { %1317 = vmatmul.msk.bf16.vlgmr.msrb.gmra.mxu2 %vm613_vm2, %v932_v40  ;;  %1319 = vmatmul.msk.bf16.vlgmr.msra.gmra.mxu0 %vm613_vm2, %v932_v40 }
 0x3da   : > { %v900_v36 = vpop.f32.mrf.mxu0 }
 0x3e1   : > { %1322 = vmatmul.msk.bf16.vlgmr.msra.gmra.mxu3 %vm613_vm2, %v933_v6 }
 0x3e9   : > { %1321 = vmatmul.msk.bf16.vlgmr.msra.gmra.mxu2 %vm613_vm2, %v932_v40 }
 0x44e   : > { %v990_v41 = vpop.f32.mrf.mxu1 }
 0x44f   : > { %v991_v10 = vadd.f32 %v1886_v44, %v990_v41 }
 0x451   : > { %1446 = vtanh.f32 %v991_v10 }
 0x454   : > { %v962_v42 = vpop.f32.mrf.mxu3 }
 0x455   : > { %v963_v43 = vadd.f32 %v1898_v51, %v962_v42 }
 0x456   : > { %v977_v46 = vpop.f32.mrf.mxu0  ;;  %v992_v47 = vpop.f32.mrf.mxu1 }
 0x457   : > { %v1447_v49 = vpop.eup %1446  ;;  %1448 = vtanh.f32 %v963_v43  ;;  %v978_v50 = vadd.f32 %v1891_v45, %v977_v46 }
 0x458   : > { %v1027_v53 = vpack.c.bf16 %v1447_v49, %v1447_v49 }
 0x459   : > { %1450 = vtanh.f32 %v978_v50 }
 0x45a   : > { %v1051_v54 = vsel %vm613_vm2, %v1027_v53, 0 }
 0x45b   : > { %1060 = vmatpush.bf16.xpose.msrb.mxu1 %v1051_v54 }
 0x45c   : > { %v946_v57 = vpop.f32.mrf.mxu2  ;;  %v964_v58 = vpop.f32.mrf.mxu3 }
 0x45d   : > { %v1449_v44 = vpop.eup %1448  ;;  %v947_v59 = vadd.f32 %v1903_v52, %v946_v57 }
 0x45e   : > { %v979_v60 = vpop.f32.mrf.mxu0  ;;  %v1025_v61 = vpack.c.bf16 %v1449_v44, %v1449_v44 }
 0x45f   : > { %v1451_v51 = vpop.eup %1450  ;;  %1452 = vtanh.f32 %v947_v59 }
 0x460   : > { %v1026_v62 = vpack.c.bf16 %v1451_v51, %v1451_v51 }
 0x462   : > { %1324 = vmatmul.msk.bf16.vlgmr.msrb.gmra.mxu1 %vm613_vm2, %v1025_v61  ;;  %v1032_v45 = vsel %vm613_vm2, %v1026_v62, 0 }
 0x463   : > { %1157 = vmatpush.bf16.msra.mxu1 %v1933_v56  ;;  %1041 = vmatpush.bf16.xpose.msrb.mxu0 %v1032_v45 }
 0x464   : > { %v948_v63 = vpop.f32.mrf.mxu2  ;;  %v1018_v0 = vpop.f32.mrf.mxu3 }
 0x465   : > { %v1453_v56 = vpop.eup %1452  ;;  %v1019_v1 = vadd.f32 %v1912_v9, %v1018_v0 }
 0x466   : > { %v1024_v52 = vpack.c.bf16 %v1453_v56, %v1453_v56 }
 0x467   : > { %1158 = vmatpush.bf16.msra.mxu1 %v1942_v12  ;;  %1454 = vtanh.f32 %v1019_v1 }
 0x46a   : > { %1323 = vmatmul.msk.bf16.vlgmr.msrb.gmra.mxu0 %vm613_vm2, %v1024_v52 }
 0x46b   : > { %1141 = vmatpush.bf16.msra.mxu0 %v1946_v31 }
 0x46c   : > { %v1005_v2 = vpop.f32.mrf.mxu2  ;;  %v1020_v3 = vpop.f32.mrf.mxu3 }
 0x46d   : > { %v1455_v4 = vpop.eup %1454  ;;  %v1006_v5 = vadd.f32 %v1918_v11, %v1005_v2 }
 0x46e   : > { %v1091_v7 = vpack.c.bf16 %v1455_v4, %v1455_v4 }
 0x46f   : > { %1142 = vmatpush.bf16.msra.mxu0 %v1950_v24  ;;  %1456 = vtanh.f32 %v1006_v5 }
 0x470   : > { %v1115_v8 = vsel %vm836_vm3, %v1091_v7, 0 }
 0x471   : > { %1124 = vmatpush.bf16.msrb.mxu3 %v1115_v8 }
 0x474   : > { %v1007_v14 = vpop.f32.mrf.mxu2 }
 0x475   : > { %v1457_v12 = vpop.eup %1456 }
 0x476   : > { %v1090_v15 = vpack.c.bf16 %v1457_v12, %v1457_v12 }
 0x478   : > { %v1096_v9 = vsel %vm836_vm3, %v1090_v15, 0 }
 0x479   : > { %1105 = vmatpush.bf16.msrb.mxu2 %v1096_v9 }
 0x4df   : > { %v1062_v16 = vpop.f32.mrf.mxu1 }
 0x4e0   : > { %v1069_v13 = vsel %vm806_vm4, %v1062_v16, -inf }
 0x4e1   : > { %1070 = vmax.xlane.f32.xlu2 %v1069_v13 }
 0x4e7   : > { %v1043_v17 = vpop.f32.mrf.mxu0  ;;  %v1064_v18 = vpop.f32.mrf.mxu1 }
 0x4e8   : > { %v1066_v27 = vsel %vm806_vm4, %v1043_v17, -inf }
 0x4e9   : > { %1067 = vmax.xlane.f32.xlu2 %v1066_v27 }
 0x4ef   : > { %v1045_v11 = vpop.f32.mrf.mxu0 }
 0x554   : > { %v1071_v31 = vpop.xlane.xlu2 %1070 }
 0x555   : > { %v1073_v19 = vsub.f32 %v1062_v16, %v1071_v31 }
 0x557   : > { %v1076_v20 = vmul.f32 1.442695, %v1073_v19 }
 0x559   : > { %1458 = vpow2.f32 %v1076_v20 }
 0x55c   : > { %v1068_v21 = vpop.xlane.xlu2 %1067 }
 0x55d   : > { %v1072_v22 = vsub.f32 %v1043_v17, %v1068_v21 }
 0x55f   : > { %v1459_v24 = vpop.eup %1458  ;;  %v1074_v25 = vmul.f32 1.442695, %v1072_v22 }
 0x560   : > { %v1081_v28 = vsel %vm806_vm4, %v1459_v24, 0.0 }
 0x561   : > { %1460 = vpow2.f32 %v1074_v25  ;;  %1082 = vadd.xlane.f32.xlu0 %v1081_v28 }
 0x567   : > { %v1461_v26 = vpop.eup %1460 }
 0x568   : > { %v1078_v29 = vsel %vm806_vm4, %v1461_v26, 0.0 }
 0x569   : > { %1079 = vadd.xlane.f32.xlu1 %v1078_v29 }
 0x5d4   : > { %v1083_v30 = vpop.xlane.xlu0 %1082 }
 0x5d5   : > { %1462 = vrcp.f32 %v1083_v30 }
 0x5db   : > { %v1463_v32 = vpop.eup %1462 }
 0x5dc   : > { %v1087_v33 = vmul.f32 %v1463_v32, %v1459_v24  ;;  %v1080_v48 = vpop.xlane.xlu1 %1079 }
 0x5dd   : > { %1464 = vrcp.f32 %v1080_v48 }
 0x5de   : > { %v1089_v34 = vpack.c.bf16 %v1087_v33, %v1087_v33 }
 0x5e0   : > { %1326 = vmatmul.msk.bf16.vlgmr.msrb.gmra.mxu3 %vm806_vm4, %v1089_v34 }
 0x5e3   : > { %v1465_v6 = vpop.eup %1464 }
 0x5e4   : > { %v1086_v37 = vmul.f32 %v1465_v6, %v1461_v26 }
 0x5e6   : > { %v1088_v38 = vpack.c.bf16 %v1086_v37, %v1086_v37 }
 0x5e8   : > { %1325 = vmatmul.msk.bf16.vlgmr.msrb.gmra.mxu2 %vm806_vm4, %v1088_v38 }
 0x663   : > { %v1126_v23 = vpop.f32.mrf.mxu3 }
 0x664   : > { %v1131_v55 = vpack.c.bf16 %v1126_v23, %v1126_v23 }
 0x666   : > { %1328 = vmatmul.msk.bf16.vlgmr.msra.gmra.mxu1 %vm613_vm2, %v1131_v55 }
 0x66b   : > { %v1107_v40 = vpop.f32.mrf.mxu2  ;;  %v1128_v36 = vpop.f32.mrf.mxu3 }
 0x66c   : > { %v1130_v41 = vpack.c.bf16 %v1107_v40, %v1107_v40 }
 0x66e   : > { %1327 = vmatmul.msk.bf16.vlgmr.msra.gmra.mxu0 %vm613_vm2, %v1130_v41 }
 0x673   : > { %v1109_v10 = vpop.f32.mrf.mxu2 }
 0x6e3   : > { %v1160_v42 = vpop.f32.mrf.mxu1 }
 0x6e4   : > { %v1161_v43 = vadd.f32 %v1960_v39, %v1160_v42 }
 0x6e6   : > { %v1165_v46 = vmax.f32 %v1161_v43, 0.0 }
 0x6e8   : > { %1167 = vrot.lane.b32.xlu2 %v1165_v46, %s1668_s14 }
 0x6eb   : > { %v1144_v47 = vpop.f32.mrf.mxu0  ;;  %v1162_v49 = vpop.f32.mrf.mxu1 }
 0x6ec   : > { %v1145_v53 = vadd.f32 %v1966_v35, %v1144_v47 }
 0x6ee   : > { %v1164_v39 = vmax.f32 %v1145_v53, 0.0 }
 0x6f3   : > { %v1146_v50 = vpop.f32.mrf.mxu0 }
 0x742   : > { %v1168_v54 = vpop.permute.xlu2 %1167 }
 0x743   : > { %v1170_v57 = vsel %vm613_vm2, %v1164_v39, %v1168_v54 }
 0x744   : > { %1172 = vst.msk [vmem:[%s444_s19] sm:$0xff] %vm1171_vm5, %v1170_v57 }
 0x745   : > { %1613 = shalt.err (!%p1610_p8)
}
 0x746   : > { %1349 = dma.vmem_to_hbm [thread:$0]  (%p1767_p5), %s1187_s23, 128, %s1189_s26, %s1174_s28  }
 0x747 PF: > { %s2064_s14 = sld [smem:[#allocation15_spill]]  ;;  %p1376_p9 = scmp.ge.s32.totalorder %s1660_s20, 2 }
 0x749   : > { %p1365_p10 = pnand %p1376_p9, %p1771_p6 }
 0x74b   : > { %p1366_p11 = pneg %p1365_p10 }
 0x74d   : > { %s1200_s24 = sand.u32 1, %s2064_s14  }
 0x74e   : > { %s1201_s13 = scalar_lea.sflag [#allocation4], %s1200_s24 }
 0x74f   : > { %1643 = dma.done.wait (%p1366_p11), %s1201_s13, 128  }
 0x750   : > { %1645 = vsyncadd (%p1366_p11), %s1201_s13, 4294967168  ;;  %s2066_s20 = sld [smem:[#allocation17_spill]]  ;;  %s2069_s17 = smov %s1652_s18 }
 0x751   : > { %s2067_s5 = sld [smem:[#allocation16_spill]] }
 0x752   : > { %s2068_s19 = sld [smem:[#allocation18_spill]] }
 0x756   : > { %p24_p12 = scmp.ge.s32.totalorder %s2066_s20, 4  }
 0x757   : > { %s2070_s18 = smov %s2067_s5 }
 0x758   :  { %26 = sbr.rel (!%p24_p12) target bundleno = 9 (0x9), region = 116 }
 0x75d   :  { %1207 = vsyncpa [#allocation3], 1 }
 0x75e   :  { %1209 = vsyncpa [#allocation3 + $0x1], 1 }
 0x75f   :  { %1210 = vsyncpa [#allocation6], 1 }
 0x760   :  { %1211 = vsyncpa [#allocation9], 1 }
 0x761   :  { %1212 = vsyncpa [#allocation4], 1 }
 0x762   :  { %1214 = vsyncpa [#allocation4 + $0x1], 1 }

</bundles_post_ra>
